<compile_context>
chip_gen: v5e
topology: v5e:2x2
jax: 0.10.0
libtpu: 0.0.40
codegen_flags: <defaults>
</compile_context>

<pallas_src>
import functools
import math

import jax
import jax.numpy as jnp
import numpy as np
from jax.experimental import pallas as pl
from jax.experimental.pallas import tpu as pltpu

BN_EPS = 1e-5


# ---------------------------------------------------------------------------
# Pallas kernel: tiled GEMM with fused bias (+ residual) + ReLU epilogue.
# ---------------------------------------------------------------------------
def _gemm_kernel(a_ref, w_ref, bias_ref, *refs, apply_relu, has_res):
    if has_res:
        res_ref, o_ref, acc_ref = refs
    else:
        res_ref = None
        o_ref, acc_ref = refs

    k = pl.program_id(2)

    @pl.when(k == 0)
    def _():
        acc_ref[...] = jnp.zeros_like(acc_ref)

    acc_ref[...] += jnp.dot(
        a_ref[...], w_ref[...], preferred_element_type=jnp.float32
    )

    @pl.when(k == pl.num_programs(2) - 1)
    def _():
        out = acc_ref[...] + bias_ref[...]
        if has_res:
            out = out + res_ref[...].astype(jnp.float32)
        if apply_relu:
            out = jnp.maximum(out, 0.0)
        o_ref[...] = out.astype(o_ref.dtype)


def _round_up(x, m):
    return ((x + m - 1) // m) * m


def _pick_tile(dim, preferred, align):
    """Tile size (multiple of `align`, dividing the padded dim) and padded dim."""
    padded = _round_up(dim, align)
    t = min(preferred, padded)
    t = max(align, (t // align) * align)
    while t > align and padded % t != 0:
        t -= align
    return t, padded


def fused_gemm(a, w, bias, res=None, *, apply_relu=True, out_dtype=jnp.float32,
               tm_pref=256, tn_pref=128, tk_pref=512):
    """out[:m,:n] = relu?((a @ w) + bias (+ res)); bf16 operands, f32 accumulation.

    a: [M, K], w: [K, N], bias: [N] or [1, N], res: optional [M, N].
    M/N/K are zero-padded to tile multiples (N, K to 128) for lane-dense MXU work.
    """
    m, k = a.shape
    kw, n = w.shape
    assert k == kw, (k, kw)

    tm, m_pad = _pick_tile(m, tm_pref, 16)     # bf16 sublane packing
    tn, n_pad = _pick_tile(n, tn_pref, 128)    # lane-dense output / MXU width
    tk, k_pad = _pick_tile(k, tk_pref, 128)

    a_p = jnp.pad(a, ((0, m_pad - m), (0, k_pad - k))).astype(jnp.bfloat16)
    w_p = jnp.pad(w, ((0, k_pad - k), (0, n_pad - n))).astype(jnp.bfloat16)
    b_p = jnp.pad(bias.reshape(1, -1).astype(jnp.float32),
                  ((0, 0), (0, n_pad - n)))

    has_res = res is not None
    inputs = [a_p, w_p, b_p]
    in_specs = [
        pl.BlockSpec((tm, tk), lambda i, j, kk: (i, kk)),
        pl.BlockSpec((tk, tn), lambda i, j, kk: (kk, j)),
        pl.BlockSpec((1, tn), lambda i, j, kk: (0, j)),
    ]
    if has_res:
        r_p = jnp.pad(res, ((0, m_pad - m), (0, n_pad - n))).astype(jnp.bfloat16)
        inputs.append(r_p)
        in_specs.append(pl.BlockSpec((tm, tn), lambda i, j, kk: (i, j)))

    grid = (m_pad // tm, n_pad // tn, k_pad // tk)

    # Explicit VMEM budget (double-buffered bf16 tiles + f32 accumulator + output).
    est = (2 * (tm * tk * 2 + tk * tn * 2 + tn * 4)
           + (2 * tm * tn * 2 if has_res else 0)
           + tm * tn * 4
           + 2 * tm * tn * jnp.dtype(out_dtype).itemsize)
    vmem_limit = int(min(64 * 2**20, max(16 * 2**20, 4 * est)))

    kernel = functools.partial(_gemm_kernel, apply_relu=apply_relu, has_res=has_res)
    out = pl.pallas_call(
        kernel,
        out_shape=jax.ShapeDtypeStruct((m_pad, n_pad), out_dtype),
        grid_spec=pltpu.PrefetchScalarGridSpec(
            num_scalar_prefetch=0,
            grid=grid,
            in_specs=in_specs,
            out_specs=pl.BlockSpec((tm, tn), lambda i, j, kk: (i, j)),
            scratch_shapes=[pltpu.VMEM((tm, tn), jnp.float32)],
        ),
        compiler_params=pltpu.CompilerParams(
            dimension_semantics=("parallel", "parallel", "arbitrary"),
            vmem_limit_bytes=vmem_limit,
        ),
    )(*inputs)
    return out[:m, :n]


# ---------------------------------------------------------------------------
# Glue: im2col, BN folding, weight reshaping, parameter construction.
# ---------------------------------------------------------------------------
def im2col(x_nhwc, ksize, stride, padding):
    """x: [N,H,W,C] -> patches [N*Ho*Wo, ksize*ksize*C] (tap-major, C-minor)."""
    n, h, w, c = x_nhwc.shape
    xp = jnp.pad(x_nhwc, ((0, 0), (padding, padding), (padding, padding), (0, 0)))
    ho = (h + 2 * padding - ksize) // stride + 1
    wo = (w + 2 * padding - ksize) // stride + 1
    taps = []
    for dh in range(ksize):
        for dw in range(ksize):
            taps.append(xp[:, dh:dh + stride * ho:stride, dw:dw + stride * wo:stride, :])
    patches = jnp.concatenate(taps, axis=-1)  # [N, Ho, Wo, k*k*C]
    return patches.reshape(n * ho * wo, ksize * ksize * c), ho, wo


def fold_bn(bn):
    """Inference BN -> per-channel (scale, bias), shaped [1, C], f32."""
    scale = bn["gamma"] / jnp.sqrt(bn["var"] + BN_EPS)
    bias = bn["beta"] - bn["mean"] * scale
    return scale.reshape(1, -1), bias.reshape(1, -1)


def conv_w_to_mat(w_oihw):
    """[O,I,kh,kw] -> [kh*kw*I, O] matching im2col tap/channel ordering."""
    o, i, kh, kw = w_oihw.shape
    return jnp.transpose(w_oihw, (2, 3, 1, 0)).reshape(kh * kw * i, o)


def make_params(key, in_ch, out_ch, stride):
    keys = jax.random.split(key, 16)

    def bn_params(k, c):
        k1, k2, k3, k4 = jax.random.split(k, 4)
        return {
            "gamma": jax.random.normal(k1, (c,), jnp.float32) * 0.1 + 1.0,
            "beta": jax.random.normal(k2, (c,), jnp.float32) * 0.1,
            "mean": jax.random.normal(k3, (c,), jnp.float32) * 0.1,
            "var": jnp.abs(jax.random.normal(k4, (c,), jnp.float32)) * 0.5 + 0.5,
        }

    params = {
        "w1": jax.random.normal(keys[0], (out_ch, in_ch, 3, 3), jnp.float32)
        * (1.0 / math.sqrt(9 * in_ch)),
        "bn1": bn_params(keys[1], out_ch),
        "w2": jax.random.normal(keys[2], (out_ch, out_ch, 3, 3), jnp.float32)
        * (1.0 / math.sqrt(9 * out_ch)),
        "bn2": bn_params(keys[3], out_ch),
    }
    if stride != 1 or in_ch != out_ch:
        params["w_ds"] = jax.random.normal(
            keys[4], (out_ch, in_ch, 1, 1), jnp.float32
        ) * (1.0 / math.sqrt(in_ch))
        params["bn_ds"] = bn_params(keys[5], out_ch)
    return params


# ---------------------------------------------------------------------------
# Forward pass (Pallas) and plain-JAX reference.
# ---------------------------------------------------------------------------
def residual_block_forward(x_nchw, params, stride):
    n, cin, h, w = x_nchw.shape
    cout = params["w1"].shape[0]
    x = jnp.transpose(x_nchw, (0, 2, 3, 1)).astype(jnp.float32)  # NHWC

    # --- conv1 (3x3, stride) + bn1 + relu : BN scale folded into weights ----
    s1, b1 = fold_bn(params["bn1"])
    w1 = conv_w_to_mat(params["w1"]) * s1                      # [9*Cin, Cout]
    a1, ho, wo = im2col(x.astype(jnp.bfloat16), 3, stride, 1)
    h1 = fused_gemm(a1, w1, b1, apply_relu=True, out_dtype=jnp.bfloat16)
    h1 = h1.reshape(n, ho, wo, cout)

    # --- conv2 (3x3, s=1) + bn2 (+ downsample fused via K-concat) + relu ----
    s2, b2 = fold_bn(params["bn2"])
    w2 = conv_w_to_mat(params["w2"]) * s2                      # [9*Cout, Cout]
    a2, _, _ = im2col(h1, 3, 1, 1)

    if "w_ds" in params:
        # Fuse the 1x1-conv+BN shortcut into the same GEMM: extra K columns.
        sd, bd = fold_bn(params["bn_ds"])
        wds = params["w_ds"].reshape(cout, cin).T * sd          # [Cin, Cout]
        xs = x[:, ::stride, ::stride, :].reshape(n * ho * wo, cin)
        a_ext = jnp.concatenate([a2, xs.astype(jnp.bfloat16)], axis=1)
        w_ext = jnp.concatenate([w2, wds], axis=0)
        y2 = fused_gemm(a_ext, w_ext, b2 + bd, apply_relu=True,
                        out_dtype=jnp.float32)
    else:
        # Identity shortcut: residual add fused into the GEMM epilogue.
        res = x.reshape(n * ho * wo, cin)
        y2 = fused_gemm(a2, w2, b2, res=res, apply_relu=True,
                        out_dtype=jnp.float32)

    out = y2.reshape(n, ho, wo, cout)
    return jnp.transpose(out, (0, 3, 1, 2))  # back to NCHW (module contract)


def residual_block_ref(x_nchw, params, stride):
    x = jnp.transpose(x_nchw, (0, 2, 3, 1)).astype(jnp.float32)

    def conv(xi, w_oihw, s, pad):
        wh = jnp.transpose(w_oihw, (2, 3, 1, 0))  # HWIO
        return jax.lax.conv_general_dilated(
            xi, wh, (s, s), ((pad, pad), (pad, pad)),
            dimension_numbers=("NHWC", "HWIO", "NHWC"))

    def bn(xi, p):
        return (xi - p["mean"]) / jnp.sqrt(p["var"] + BN_EPS) * p["gamma"] + p["beta"]

    out = jax.nn.relu(bn(conv(x, params["w1"], stride, 1), params["bn1"]))
    out = bn(conv(out, params["w2"], 1, 1), params["bn2"])
    if "w_ds" in params:
        res = bn(conv(x, params["w_ds"], stride, 0), params["bn_ds"])
    else:
        res = x
    out = jax.nn.relu(out + res)
    return jnp.transpose(out, (0, 3, 1, 2))


if __name__ == "__main__":
    key = jax.random.PRNGKey(0)
    k_x1, k_p1, k_x2, k_p2 = jax.random.split(key, 4)

    # Config A: strided block with downsample branch (fused into GEMM 2).
    N, CIN, COUT, H, W, STRIDE = 2, 4, 8, 16, 16, 2
    x_a = jax.random.normal(k_x1, (N, CIN, H, W), jnp.float32)
    p_a = make_params(k_p1, CIN, COUT, STRIDE)
    out_a = jax.block_until_ready(residual_block_forward(x_a, p_a, STRIDE))
    ref_a = jax.block_until_ready(residual_block_ref(x_a, p_a, STRIDE))
    np.testing.assert_allclose(np.asarray(out_a), np.asarray(ref_a),
                               rtol=5e-2, atol=5e-2)

    # Config B: identity shortcut (residual fused into GEMM 2 epilogue).
    x_b = jax.random.normal(k_x2, (2, 8, 16, 16), jnp.float32)
    p_b = make_params(k_p2, 8, 8, 1)
    out_b = jax.block_until_ready(residual_block_forward(x_b, p_b, 1))
    ref_b = jax.block_until_ready(residual_block_ref(x_b, p_b, 1))
    np.testing.assert_allclose(np.asarray(out_b), np.asarray(ref_b),
                               rtol=5e-2, atol=5e-2)

    print("KERNEL_OK")
</pallas_src>

<mosaic_0001>
module attributes {stable_mosaic.version = 11 : i64} {
  func.func @_gemm_kernel(%arg0: i32, %arg1: i32, %arg2: i32, %arg3: memref<128x128xbf16, #tpu.memory_space<vmem>>, %arg4: memref<128x128xbf16, #tpu.memory_space<vmem>>, %arg5: memref<1x128xf32, #tpu.memory_space<vmem>>, %arg6: memref<128x128xbf16, #tpu.memory_space<vmem>>, %arg7: memref<128x128xf32, #tpu.memory_space<vmem>>) attributes {dimension_semantics = [#tpu.dimension_semantics<parallel>, #tpu.dimension_semantics<parallel>, #tpu.dimension_semantics<arbitrary>], iteration_bounds = array<i64: 1, 1, 1>, scalar_prefetch = 0 : i64, scratch_operands = 1 : i64, tpu.core_type = #tpu.core_type<tc>, window_params = [{transform_indices = @transform_0, window_bounds = array<i64: 128, 128>}, {transform_indices = @transform_1, window_bounds = array<i64: 128, 128>}, {transform_indices = @transform_2, window_bounds = array<i64: 1, 128>}, {transform_indices = @transform_3, window_bounds = array<i64: 128, 128>}]} {
    %c0_i32 = arith.constant 0 : i32
    %0 = arith.cmpi eq, %arg2, %c0_i32 : i32
    %1 = arith.extui %0 : i1 to i32
    %c0_i32_0 = arith.constant 0 : i32
    %2 = arith.cmpi ne, %1, %c0_i32_0 : i32
    scf.if %2 {
      %cst_10 = arith.constant 0.000000e+00 : f32
      %12 = vector.broadcast %cst_10 : f32 to vector<128x128xf32>
      %c0_11 = arith.constant 0 : index
      %c0_12 = arith.constant 0 : index
      %13 = vector.load %arg7[%c0_11, %c0_12] : memref<128x128xf32, #tpu.memory_space<vmem>>, vector<128x128xf32>
      tpu.vector_store %arg7[%c0_11, %c0_12], %12 {strides = array<i32>} : memref<128x128xf32, #tpu.memory_space<vmem>>, vector<128x128xf32>,
    } else {
    }
    %c0 = arith.constant 0 : index
    %c0_1 = arith.constant 0 : index
    %3 = vector.load %arg7[%c0, %c0_1] : memref<128x128xf32, #tpu.memory_space<vmem>>, vector<128x128xf32>
    %c0_2 = arith.constant 0 : index
    %c0_3 = arith.constant 0 : index
    %4 = vector.load %arg3[%c0_2, %c0_3] : memref<128x128xbf16, #tpu.memory_space<vmem>>, vector<128x128xbf16>
    %c0_4 = arith.constant 0 : index
    %c0_5 = arith.constant 0 : index
    %5 = vector.load %arg4[%c0_4, %c0_5] : memref<128x128xbf16, #tpu.memory_space<vmem>>, vector<128x128xbf16>
    %cst = arith.constant dense<0.000000e+00> : vector<128x128xf32>
    %6 = tpu.matmul %4, %5, %cst {dimension_numbers = #tpu.dot_dimension_numbers<[1], [0], [0], [1], [0, 0, 1, 1], [], []>} : vector<128x128xbf16>, vector<128x128xbf16>, vector<128x128xf32> -> vector<128x128xf32>
    %7 = arith.addf %3, %6 : vector<128x128xf32>
    %c0_6 = arith.constant 0 : index
    %c0_7 = arith.constant 0 : index
    %8 = vector.load %arg7[%c0_6, %c0_7] : memref<128x128xf32, #tpu.memory_space<vmem>>, vector<128x128xf32>
    tpu.vector_store %arg7[%c0_6, %c0_7], %7 {strides = array<i32>} : memref<128x128xf32, #tpu.memory_space<vmem>>, vector<128x128xf32>,
    %c0_i32_8 = arith.constant 0 : i32
    %9 = arith.cmpi eq, %arg2, %c0_i32_8 : i32
    %10 = arith.extui %9 : i1 to i32
    %c0_i32_9 = arith.constant 0 : i32
    %11 = arith.cmpi ne, %10, %c0_i32_9 : i32
    scf.if %11 {
      %c0_10 = arith.constant 0 : index
      %c0_11 = arith.constant 0 : index
      %12 = vector.load %arg7[%c0_10, %c0_11] : memref<128x128xf32, #tpu.memory_space<vmem>>, vector<128x128xf32>
      %c0_12 = arith.constant 0 : index
      %c0_13 = arith.constant 0 : index
      %13 = vector.load %arg5[%c0_12, %c0_13] : memref<1x128xf32, #tpu.memory_space<vmem>>, vector<1x128xf32>
      %14 = vector.broadcast %13 : vector<1x128xf32> to vector<128x128xf32>
      %15 = arith.addf %12, %14 : vector<128x128xf32>
      %cst_14 = arith.constant 0.000000e+00 : f32
      %16 = vector.broadcast %cst_14 : f32 to vector<128x128xf32>
      %17 = arith.maximumf %15, %16 : vector<128x128xf32>
      %18 = arith.truncf %17 : vector<128x128xf32> to vector<128x128xbf16>
      %c0_15 = arith.constant 0 : index
      %c0_16 = arith.constant 0 : index
      %19 = vector.load %arg6[%c0_15, %c0_16] : memref<128x128xbf16, #tpu.memory_space<vmem>>, vector<128x128xbf16>
      tpu.vector_store %arg6[%c0_15, %c0_16], %18 {strides = array<i32>} : memref<128x128xbf16, #tpu.memory_space<vmem>>, vector<128x128xbf16>,
    } else {
    }
    return
  }
  func.func @transform_0(%arg0: i32, %arg1: i32, %arg2: i32) -> (i32, i32) {
    %c0_i32 = arith.constant 0 : i32
    return %arg0, %arg2 : i32, i32
  }
  func.func @transform_1(%arg0: i32, %arg1: i32, %arg2: i32) -> (i32, i32) {
    %c0_i32 = arith.constant 0 : i32
    return %arg2, %arg1 : i32, i32
  }
  func.func @transform_2(%arg0: i32, %arg1: i32, %arg2: i32) -> (i32, i32) {
    %c0_i32 = arith.constant 0 : i32
    %c0_i32_0 = arith.constant 0 : i32
    return %c0_i32, %arg1 : i32, i32
  }
  func.func @transform_3(%arg0: i32, %arg1: i32, %arg2: i32) -> (i32, i32) {
    %c0_i32 = arith.constant 0 : i32
    return %arg0, %arg1 : i32, i32
  }
}

</mosaic_0001>

<bundles_post_ra>
// kernel: tpu_custom_call.1
= control target key start
LH: loop header
LB: loop body
LE: loop exit
PB: predicated region body
PF: predicated region fallthrough
CT: control target
= control target key end

     0   :  { %8 = vsyncpa [#allocation4], 0  ;;  %s680_s0 = inlined_call_operand.hbm [shape: bf16[128,128], index: 0, kind: input, shape index: {}]   ;;  %s681_s1 = inlined_call_operand.hbm [shape: bf16[128,128], index: 1, kind: input, shape index: {}]   ;;  %s682_s2 = inlined_call_operand.vmem [shape: f32[1,128], index: 2, kind: input, shape index: {}]   ;;  %s683_s3 = inlined_call_operand.hbm [shape: bf16[128,128], index: 3, kind: output, shape index: {}]  }
   0x1   :  { %9 = vsyncpa [#allocation7], 0 }
   0x2   :  { %10 = vsyncpa [#allocation5], 0  ;;  %s15_s14 = sshll.u32 %s680_s0, 4  ;;  %s634_s15 = smov [#allocation3]   ;;  %s16_s14 = int_to_ptr.hbm [resolvable:$true] %s15_s14 }
   0x3   :  { %s17_s16 = sshll.u32 %s634_s15, 4  ;;  %s28_s19 = sshll.u32 %s681_s1, 4  ;;  %s18_s16 = int_to_ptr.vmem [resolvable:$true] %s17_s16  ;;  %s29_s19 = int_to_ptr.hbm [resolvable:$true] %s28_s19 }
   0x4   :  { %s635_s20 = smov 64   ;;  %s636_s21 = smov 4  }
   0x5   :  { %23 = dma.hbm_to_vmem [thread:$0]  %s16_s14, 1024, %s18_s16, [#allocation4], %s635_s20, %s635_s20, %s636_s21  }
   0x6   :  { %s637_s22 = smov [#allocation6]  }
   0x7   :  { %s30_s23 = sshll.u32 %s637_s22, 4  ;;  %s31_s23 = int_to_ptr.vmem [resolvable:$true] %s30_s23 }
   0x8   :  { %36 = dma.hbm_to_vmem [thread:$0]  %s29_s19, 1024, %s31_s23, [#allocation7], %s635_s20, %s635_s20, %s636_s21  }
   0x9   :  { %628 = dma.done.wait [#allocation4], 1024  }
   0xa   :  { %629 = vsyncadd [#allocation4], 4294966272 }
   0xb   :  { %630 = dma.done.wait [#allocation7], 1024  }
   0xc   :  { %631 = vsyncadd [#allocation7], 4294966272  ;;  %v478_v0 = vld [vmem:[#allocation6 + $0x38] sm:$0xff]  ;;  %v477_v1 = vld [vmem:[#allocation6 + $0x30] sm:$0xff]  ;;  %s385_s27 = sshll.u32 %s683_s3, 4  ;;  %s386_s27 = int_to_ptr.hbm [resolvable:$true] %s385_s27 }
   0xd   :  { %211 = vmatpush.bf16.msra.mxu0 %v478_v0  ;;  %526 = vmatpush.bf16.msra.mxu1 %v478_v0  ;;  %v476_v2 = vld [vmem:[#allocation6 + $0x28] sm:$0xff]  ;;  %v475_v3 = vld [vmem:[#allocation6 + $0x20] sm:$0xff]  ;;  %v474_v4 = vld [vmem:[#allocation6 + $0x18] sm:$0xff] }
   0xe   :  { %527 = vmatpush.bf16.msra.mxu2 %v478_v0  ;;  %528 = vmatpush.bf16.msra.mxu3 %v478_v0  ;;  %v473_v5 = vld [vmem:[#allocation6 + $0x10] sm:$0xff]  ;;  %v472_v6 = vld [vmem:[#allocation6 + $0x8] sm:$0xff]  ;;  %v471_v7 = vld [vmem:[#allocation6] sm:$0xff] }
   0xf   :  { %v463_v8 = vld [vmem:[#allocation3] sm:$0xff]  ;;  %v465_v9 = vld [vmem:[#allocation3 + $0x10] sm:$0xff]  ;;  %v464_v12 = vld [vmem:[#allocation3 + $0x8] sm:$0xff] }
  0x10   :  { %v467_v10 = vld [vmem:[#allocation3 + $0x20] sm:$0xff]  ;;  %v469_v11 = vld [vmem:[#allocation3 + $0x30] sm:$0xff]  ;;  %v466_v13 = vld [vmem:[#allocation3 + $0x18] sm:$0xff] }
  0x11   :  { %212 = vmatpush.bf16.msra.mxu0 %v477_v1  ;;  %529 = vmatpush.bf16.msra.mxu1 %v477_v1  ;;  %v468_v14 = vld [vmem:[#allocation3 + $0x28] sm:$0xff]  ;;  %v470_v15 = vld [vmem:[#allocation3 + $0x38] sm:$0xff]  ;;  %v555_v18 = vld [vmem:[%s682_s2] ss:$0 sm:$0xff]  ;;  %s638_s2 = smov [#allocation8]  }
  0x12   :  { %530 = vmatpush.bf16.msra.mxu2 %v477_v1  ;;  %531 = vmatpush.bf16.msra.mxu3 %v477_v1  ;;  %s383_s24 = sshll.u32 %s638_s2, 4  ;;  %s384_s24 = int_to_ptr.vmem [resolvable:$true] %s383_s24 }
  0x15   :  { %213 = vmatpush.bf16.msra.mxu0 %v476_v2  ;;  %532 = vmatpush.bf16.msra.mxu1 %v476_v2 }
  0x16   :  { %533 = vmatpush.bf16.msra.mxu2 %v476_v2  ;;  %534 = vmatpush.bf16.msra.mxu3 %v476_v2 }
  0x19   :  { %214 = vmatpush.bf16.msra.mxu0 %v475_v3  ;;  %535 = vmatpush.bf16.msra.mxu1 %v475_v3 }
  0x1a   :  { %536 = vmatpush.bf16.msra.mxu2 %v475_v3  ;;  %537 = vmatpush.bf16.msra.mxu3 %v475_v3 }
  0x1d   :  { %215 = vmatpush.bf16.msra.mxu0 %v474_v4  ;;  %538 = vmatpush.bf16.msra.mxu1 %v474_v4 }
  0x1e   :  { %539 = vmatpush.bf16.msra.mxu2 %v474_v4  ;;  %540 = vmatpush.bf16.msra.mxu3 %v474_v4 }
  0x21   :  { %216 = vmatpush.bf16.msra.mxu0 %v473_v5  ;;  %541 = vmatpush.bf16.msra.mxu1 %v473_v5 }
  0x22   :  { %542 = vmatpush.bf16.msra.mxu2 %v473_v5  ;;  %543 = vmatpush.bf16.msra.mxu3 %v473_v5 }
  0x25   :  { %217 = vmatpush.bf16.msra.mxu0 %v472_v6  ;;  %544 = vmatpush.bf16.msra.mxu1 %v472_v6 }
  0x26   :  { %545 = vmatpush.bf16.msra.mxu2 %v472_v6  ;;  %546 = vmatpush.bf16.msra.mxu3 %v472_v6 }
  0x29   :  { %218 = vmatpush.bf16.msra.mxu0 %v471_v7  ;;  %547 = vmatpush.bf16.msra.mxu1 %v471_v7 }
  0x2a   :  { %548 = vmatpush.bf16.msra.mxu2 %v471_v7  ;;  %549 = vmatpush.bf16.msra.mxu3 %v471_v7 }
  0x2c   :  { %219 = vmatmul.bf16.vlgmr.msra.gmra.mxu0 %v463_v8  ;;  %229 = vmatmul.bf16.vlgmr.msra.gmra.mxu1 %v465_v9 }
  0x2d   :  { %239 = vmatmul.bf16.vlgmr.msra.gmra.mxu2 %v467_v10  ;;  %249 = vmatmul.bf16.vlgmr.msra.gmra.mxu3 %v469_v11 }
  0x3c   :  { %224 = vmatmul.bf16.gmra.mxu0 %v464_v12  ;;  %234 = vmatmul.bf16.gmra.mxu1 %v466_v13 }
  0x3d   :  { %244 = vmatmul.bf16.gmra.mxu2 %v468_v14  ;;  %254 = vmatmul.bf16.gmra.mxu3 %v470_v15 }
  0xa9   :  { %v220_v16 = vpop.f32.mrf.mxu0  ;;  %v230_v17 = vpop.f32.mrf.mxu1 }
  0xaa   :  { %v315_v19 = vadd.f32 %v555_v18, %v220_v16  ;;  %v319_v20 = vadd.f32 %v555_v18, %v230_v17 }
  0xac   :  { %v331_v27 = vmax.f32 %v315_v19, 0.0  ;;  %v335_v28 = vmax.f32 %v319_v20, 0.0 }
  0xb0   :  { %v240_v21 = vpop.f32.mrf.mxu2  ;;  %v250_v22 = vpop.f32.mrf.mxu3 }
  0xb1   :  { %v222_v23 = vpop.f32.mrf.mxu0  ;;  %v232_v24 = vpop.f32.mrf.mxu1  ;;  %v323_v33 = vadd.f32 %v555_v18, %v240_v21  ;;  %v327_v34 = vadd.f32 %v555_v18, %v250_v22 }
  0xb2   :  { %v316_v25 = vadd.f32 %v555_v18, %v222_v23  ;;  %v320_v26 = vadd.f32 %v555_v18, %v232_v24 }
  0xb3   :  { %v339_v41 = vmax.f32 %v323_v33, 0.0  ;;  %v343_v42 = vmax.f32 %v327_v34, 0.0 }
  0xb4   :  { %v332_v29 = vmax.f32 %v316_v25, 0.0  ;;  %v336_v30 = vmax.f32 %v320_v26, 0.0 }
  0xb6   :  { %v482_v31 = vpack.c.bf16 %v332_v29, %v331_v27  ;;  %v492_v32 = vpack.c.bf16 %v336_v30, %v335_v28 }
  0xb8   :  { %483 = vst [vmem:[#allocation8] sm:$0xff] %v482_v31   ;;  %v242_v35 = vpop.f32.mrf.mxu2  ;;  %v252_v36 = vpop.f32.mrf.mxu3 }
  0xb9   :  { %520 = vst [vmem:[#allocation8 + $0x10] sm:$0xff] %v492_v32   ;;  %v324_v37 = vadd.f32 %v555_v18, %v242_v35  ;;  %v328_v38 = vadd.f32 %v555_v18, %v252_v36  ;;  %v225_v39 = vpop.f32.mrf.mxu0  ;;  %v235_v40 = vpop.f32.mrf.mxu1 }
  0xba   :  { %v317_v47 = vadd.f32 %v555_v18, %v225_v39  ;;  %v321_v48 = vadd.f32 %v555_v18, %v235_v40 }
  0xbb   :  { %v340_v43 = vmax.f32 %v324_v37, 0.0  ;;  %v344_v44 = vmax.f32 %v328_v38, 0.0 }
  0xbc   :  { %v333_v55 = vmax.f32 %v317_v47, 0.0  ;;  %v337_v56 = vmax.f32 %v321_v48, 0.0 }
  0xbd   :  { %v502_v45 = vpack.c.bf16 %v340_v43, %v339_v41  ;;  %v512_v46 = vpack.c.bf16 %v344_v44, %v343_v42 }
  0xbf   :  { %522 = vst [vmem:[#allocation8 + $0x20] sm:$0xff] %v502_v45  }
  0xc0   :  { %524 = vst [vmem:[#allocation8 + $0x30] sm:$0xff] %v512_v46   ;;  %v245_v49 = vpop.f32.mrf.mxu2  ;;  %v255_v50 = vpop.f32.mrf.mxu3 }
  0xc1   :  { %v227_v51 = vpop.f32.mrf.mxu0  ;;  %v237_v52 = vpop.f32.mrf.mxu1  ;;  %v325_v61 = vadd.f32 %v555_v18, %v245_v49  ;;  %v329_v62 = vadd.f32 %v555_v18, %v255_v50 }
  0xc2   :  { %v318_v53 = vadd.f32 %v555_v18, %v227_v51  ;;  %v322_v54 = vadd.f32 %v555_v18, %v237_v52 }
  0xc3   :  { %v341_v3 = vmax.f32 %v325_v61, 0.0  ;;  %v345_v4 = vmax.f32 %v329_v62, 0.0 }
  0xc4   :  { %v334_v57 = vmax.f32 %v318_v53, 0.0  ;;  %v338_v58 = vmax.f32 %v322_v54, 0.0 }
  0xc6   :  { %v487_v59 = vpack.c.bf16 %v334_v57, %v333_v55  ;;  %v497_v60 = vpack.c.bf16 %v338_v58, %v337_v56 }
  0xc8   :  { %519 = vst [vmem:[#allocation8 + $0x8] sm:$0xff] %v487_v59   ;;  %v247_v63 = vpop.f32.mrf.mxu2  ;;  %v257_v0 = vpop.f32.mrf.mxu3 }
  0xc9   :  { %521 = vst [vmem:[#allocation8 + $0x18] sm:$0xff] %v497_v60   ;;  %v326_v1 = vadd.f32 %v555_v18, %v247_v63  ;;  %v330_v2 = vadd.f32 %v555_v18, %v257_v0 }
  0xcb   :  { %v342_v5 = vmax.f32 %v326_v1, 0.0  ;;  %v346_v6 = vmax.f32 %v330_v2, 0.0 }
  0xcd   :  { %v507_v7 = vpack.c.bf16 %v342_v5, %v341_v3  ;;  %v517_v8 = vpack.c.bf16 %v346_v6, %v345_v4 }
  0xcf   :  { %523 = vst [vmem:[#allocation8 + $0x28] sm:$0xff] %v507_v7  }
  0xd0   :  { %525 = vst [vmem:[#allocation8 + $0x38] sm:$0xff] %v517_v8  }
  0xd1   :  { %391 = dma.vmem_to_hbm [thread:$0]  %s384_s24, 1024, %s386_s27, [#allocation5], %s635_s20, %s635_s20, %s636_s21  }
  0xd2   :  { %632 = dma.done.wait [#allocation5], 1024  }
  0xd3   :  { %633 = vsyncadd [#allocation5], 4294966272 }
  0xd4   :  { %396 = vsyncpa [#allocation4], 1 }
  0xd5   :  { %397 = vsyncpa [#allocation7], 1 }
  0xd6   :  { %398 = vsyncpa [#allocation5], 1 }

</bundles_post_ra>
